<compile_context>
chip_gen: v7x
topology: tpu7x:2x2x1
jax: 0.10.0
libtpu: 0.0.40
codegen_flags: <defaults>
</compile_context>

<pallas_src>
import functools

import jax
import jax.numpy as jnp
from jax import lax
from jax.experimental import pallas as pl
from jax.experimental.pallas import tpu as pltpu


def _round_up(a, m):
    return (a + m - 1) // m * m


# --------------------------------------------------------------------------
# General path: 2-D grid (row blocks [parallel], col blocks [arbitrary]).
# --------------------------------------------------------------------------
def _gem_kernel(p_ref, x_ref, o_ref, acc_ref, *, eps, total_cols, col_block,
                rem, mask_cols, int_p, compute_dtype):
    # p_ref:   SMEM (1,) f32 scalar-prefetch (GeM exponent).
    # x_ref:   VMEM (row_block, col_block) input tile.
    # o_ref:   VMEM (1, row_block) lane-dense output tile (written on last j).
    # acc_ref: VMEM (row_block, <=128) f32 running partial sums of x**p.
    j = pl.program_id(1)
    last = pl.num_programs(1) - 1

    @pl.when(j == 0)
    def _init():
        acc_ref[...] = jnp.zeros_like(acc_ref)

    def term(lo, w):
        # clamp + pow on one 128-lane chunk, loaded straight from the ref so
        # no whole-tile temporaries live in VMEM.
        xc = x_ref[:, lo:lo + w]
        if xc.dtype != compute_dtype:
            xc = xc.astype(compute_dtype)
        xc = jnp.maximum(xc, jnp.asarray(eps, compute_dtype))
        if int_p is not None:
            y = xc                              # pure VPU multiplies, no EUP
            for _ in range(int_p - 1):
                y = y * xc
            return y
        pv = p_ref[0].astype(compute_dtype)     # x >= eps > 0 -> exp/log OK
        return jnp.exp(pv * jnp.log(xc))

    cw = min(col_block, 128)                    # accumulator lane width
    n_chunks = pl.cdiv(col_block, cw)
    for k in range(n_chunks):
        lo = k * cw
        w = min(cw, col_block - lo)
        if (not mask_cols) or (lo + w <= rem):
            # Chunk can never overlap the column tail (or there is no tail).
            if w == cw:
                acc_ref[...] += term(lo, w)
            else:
                # Ragged last chunk of a single full-width column block; it
                # just folds into the low lanes of the partial-sum buffer.
                acc_ref[:, :w] += term(lo, w)
        elif lo >= rem:
            # Fully out-of-range in the tail column block; valid elsewhere.
            @pl.when(j < last)
            def _add(lo=lo, w=w):
                acc_ref[...] += term(lo, w)
        else:
            # Straddles the true column count only in the tail block: the
            # iota/compare/select cost is confined to this one chunk there.
            @pl.when(j == last)
            def _tail(lo=lo, w=w):
                t = term(lo, w)
                lane = lax.broadcasted_iota(jnp.int32, t.shape, 1)
                acc_ref[...] += jnp.where(lo + lane < rem, t, 0)

            @pl.when(j < last)
            def _full(lo=lo, w=w):
                acc_ref[...] += term(lo, w)

    @pl.when(j == last)
    def _finalize():
        # Tiny lane-sum contraction -> lane-dense (1, row_block).  HIGHEST
        # keeps the f32 accumulator exact; it only touches row_block*128
        # elements once per row block, negligible vs. the data volume.
        ones = jnp.ones((1, acc_ref.shape[1]), jnp.float32)
        sums = lax.dot_general(
            ones, acc_ref[...], (((1,), (1,)), ((), ())),
            precision=lax.Precision.HIGHEST,
            preferred_element_type=jnp.float32)
        mean = sums * (1.0 / float(total_cols))     # true H*W, not block width
        inv_p = 1.0 / p_ref[0]
        o_ref[...] = jnp.exp(jnp.log(mean) * inv_p).astype(o_ref.dtype)


# --------------------------------------------------------------------------
# Lane-folded path for small spatial extents (cols < 128).
# --------------------------------------------------------------------------
def _gem_fold_kernel(p_ref, x_ref, o_ref, *, eps, cols, g, int_p,
                     compute_dtype):
    # x_ref: VMEM (row_block, g*cols) -- each lane-row holds g logical rows.
    # o_ref: VMEM (g, row_block) lane-dense results (out[s, r] = row r*g+s).
    x = x_ref[...]
    if x.dtype != compute_dtype:
        x = x.astype(compute_dtype)
    x = jnp.maximum(x, jnp.asarray(eps, compute_dtype))
    if int_p is not None:
        xp = x
        for _ in range(int_p - 1):
            xp = xp * x
    else:
        pv = p_ref[0].astype(compute_dtype)
        xp = jnp.exp(pv * jnp.log(x))

    lf = g * cols
    seg = lax.broadcasted_iota(jnp.int32, (g, lf), 0)
    lane = lax.broadcasted_iota(jnp.int32, (g, lf), 1)
    bd = jnp.logical_and(lane >= seg * cols, lane < (seg + 1) * cols)
    bd = bd.astype(jnp.bfloat16)                # exact 0/1 block-diag weights

    dn = (((1,), (1,)), ((), ()))
    if xp.dtype == jnp.bfloat16:
        # Native single-pass bf16 MXU, f32 accumulation.
        sums = lax.dot_general(bd, xp, dn, preferred_element_type=jnp.float32)
    else:
        # f32 operand: hi/lo bf16 split -> 2 native MXU passes instead of the
        # 6-pass Precision.HIGHEST lowering; per-term error ~2^-18 relative.
        hi = xp.astype(jnp.bfloat16)
        lo = (xp - hi.astype(jnp.float32)).astype(jnp.bfloat16)
        sums = (lax.dot_general(bd, hi, dn, preferred_element_type=jnp.float32)
                + lax.dot_general(bd, lo, dn,
                                  preferred_element_type=jnp.float32))

    mean = sums * (1.0 / float(cols))           # (g, row_block)
    inv_p = 1.0 / p_ref[0]
    o_ref[...] = jnp.exp(jnp.log(mean) * inv_p).astype(o_ref.dtype)


# --------------------------------------------------------------------------
# Wrapper
# --------------------------------------------------------------------------
def _detect_int_p(p_arr, static_p):
    if static_p is not None:
        sp = float(static_p)
        return int(sp) if sp.is_integer() and 1.0 <= sp <= 8.0 else None
    try:
        pv = float(jax.device_get(p_arr).reshape(-1)[0])
    except Exception:
        return None          # traced p (under jit) -> general exp/log path
    if pv == round(pv) and 1.0 <= pv <= 8.0:
        return int(round(pv))
    return None


def _row_block_for(rows, bytes_per_padded_row, target_tile_bytes, sublane):
    budget = max(sublane, target_tile_bytes // bytes_per_padded_row)
    if rows >= 256:
        # Force >= 2 blocks on the parallel row axis so both v7x TensorCores
        # get work; block must be a multiple of 128 for the lane-dense output.
        rb = min(budget, _round_up(pl.cdiv(rows, 2), 128))
        rb = max(128, (int(rb) // 128) * 128)
    elif rows <= budget:
        rb = _round_up(rows, sublane)           # single block covers all rows
    else:
        rb = max(128, (int(budget) // 128) * 128)
    return int(rb)


def _vmem_limit(in_tile_bytes, work_bytes):
    need = 2 * in_tile_bytes + work_bytes + (4 << 20)
    # Cap below v7x's 64 MiB physical VMEM; v5e/v6e (128 MiB) could go higher.
    return int(min(48 << 20, max(32 << 20, need)))


def gem_pooling(x, p, eps=1e-6, *, static_p=None, bf16_compute=True,
                target_tile_bytes=8 * 1024 * 1024, max_cols_per_block=8192):
    """GeM pooling.  x: (N, C, H, W); p: shape-(1,) learnable exponent.

    static_p: optionally pin the exponent at trace time so jitted callers hit
    the integer-p (multiply-only, no EUP) path.  bf16_compute: compute the
    clamp/pow natively in bf16 for bf16 inputs (recommended on v6e/v7x; v5e
    callers may pass False).
    """
    N, C, H, W = x.shape
    rows, cols = N * C, H * W
    itemsize = jnp.dtype(x.dtype).itemsize
    sublane = {4: 8, 2: 16, 1: 32}.get(itemsize, 8)
    compute_dtype = (jnp.bfloat16
                     if (x.dtype == jnp.bfloat16 and bf16_compute)
                     else jnp.float32)

    p_arr = jnp.asarray(p, dtype=jnp.float32).reshape((1,))
    int_p = _detect_int_p(p_arr, static_p)

    # ---- lane-folding factor for small spatial extents --------------------
    g = 1
    if cols < 128:
        while g * 2 * cols <= 128 and rows % (g * 2) == 0:
            g *= 2

    if g >= 2:
        # ---------------- folded path (typical GeM: cols = 49) -------------
        rows_f, lf = rows // g, g * cols
        x_f = x.reshape(rows_f, lf)             # free, contiguous reshape
        rb = _row_block_for(rows_f, 128 * itemsize, target_tile_bytes, sublane)
        nrb = pl.cdiv(rows_f, rb)
        padded = nrb * rb

        in_tile = _round_up(rb, sublane) * 128 * itemsize
        work = rb * 128 * 4 * 4                 # xp / hi / lo f32 temps

        kernel = functools.partial(
            _gem_fold_kernel, eps=float(eps), cols=cols, g=g, int_p=int_p,
            compute_dtype=compute_dtype)

        out = pl.pallas_call(
            kernel,
            out_shape=jax.ShapeDtypeStruct((g, padded), x.dtype),
            grid_spec=pltpu.PrefetchScalarGridSpec(
                num_scalar_prefetch=1,
                grid=(nrb,),
                in_specs=[pl.BlockSpec((rb, lf), lambda i, p_ref: (i, 0))],
                out_specs=pl.BlockSpec((g, rb), lambda i, p_ref: (0, i))),
            compiler_params=pltpu.CompilerParams(
                dimension_semantics=("parallel",),
                vmem_limit_bytes=_vmem_limit(in_tile, work)),
        )(p_arr, x_f)

        # out[s, rf] is the result for original row rf*g + s; tail rows (OOB
        # reads in the partial last block) are garbage and sliced off.
        res = out[:, :rows_f].T.reshape(rows)
        return res.reshape(N, C, 1, 1)

    # -------------------- general path (cols >= 128, or no usable fold) ----
    x2 = x.reshape(rows, cols)
    if cols <= max_cols_per_block:
        col_block = cols                        # full last dim: no (…,128) req
    else:
        col_block = max(128, (int(max_cols_per_block) // 128) * 128)
    ncb = pl.cdiv(cols, col_block)
    rem = cols % col_block
    mask_cols = rem != 0
    col_pad = _round_up(col_block, 128)

    rb = _row_block_for(rows, col_pad * itemsize, target_tile_bytes, sublane)
    nrb = pl.cdiv(rows, rb)
    padded_rows = nrb * rb
    acc_w = min(col_block, 128)

    in_tile = _round_up(rb, sublane) * col_pad * itemsize
    work = rb * 128 * 4 * 6                     # accumulator + chunk temps

    kernel = functools.partial(
        _gem_kernel, eps=float(eps), total_cols=cols, col_block=col_block,
        rem=rem, mask_cols=mask_cols, int_p=int_p, compute_dtype=compute_dtype)

    out = pl.pallas_call(
        kernel,
        out_shape=jax.ShapeDtypeStruct((1, padded_rows), x.dtype),
        grid_spec=pltpu.PrefetchScalarGridSpec(
            num_scalar_prefetch=1,
            grid=(nrb, ncb),
            in_specs=[pl.BlockSpec((rb, col_block), lambda i, j, p_ref: (i, j))],
            out_specs=pl.BlockSpec((1, rb), lambda i, j, p_ref: (0, i)),
            scratch_shapes=[pltpu.VMEM((rb, acc_w), jnp.float32)]),
        compiler_params=pltpu.CompilerParams(
            dimension_semantics=("parallel", "arbitrary"),
            vmem_limit_bytes=_vmem_limit(in_tile, work)),
    )(p_arr, x2)

    # Tail rows (if any) are garbage from OOB partial-block reads; slice off.
    return out[0, :rows].reshape(N, C, 1, 1)


def gem_pooling_ref(x, p, eps=1e-6):
    """Pure-JAX reference matching the PyTorch forward."""
    xf = x.astype(jnp.float32)
    xp = jnp.maximum(xf, eps) ** p[0]
    pooled = jnp.mean(xp, axis=(2, 3), keepdims=True)
    return (pooled ** (1.0 / p[0])).astype(x.dtype)


if __name__ == "__main__":
    eps = 1e-6
    key = jax.random.PRNGKey(0)
    k1, k2, k3, k4, k5 = jax.random.split(key, 5)

    def check(x, p, rtol, atol, **kw):
        out = jax.block_until_ready(gem_pooling(x, p, eps, **kw))
        ref = gem_pooling_ref(x, p, eps)
        assert out.shape == ref.shape, (out.shape, ref.shape)
        o32, r32 = out.astype(jnp.float32), ref.astype(jnp.float32)
        err = jnp.max(jnp.abs(o32 - r32))
        assert jnp.allclose(o32, r32, rtol=rtol, atol=atol), (
            f"max abs err = {err}")

    p3 = jnp.ones((1,), jnp.float32) * 3.0      # module default: ones(1) * 3
    p35 = jnp.ones((1,), jnp.float32) * 3.5

    # 1) integer-p fast path, cols=256, single row/col block.
    x1 = jax.random.uniform(k1, (2, 4, 16, 16), jnp.float32, -0.5, 2.0)
    check(x1, p3, 1e-4, 1e-5)

    # 2) non-integer p (exp/log path), cols=153:
    #    (a) single column block with a ragged last 128-lane chunk,
    #    (b) forced column tiling + tail-chunk masking.
    x2 = jax.random.uniform(k2, (3, 5, 9, 17), jnp.float32, -1.0, 3.0)
    check(x2, p35, 1e-4, 1e-5)
    check(x2, p35, 1e-4, 1e-5, max_cols_per_block=128)

    # 3) lane-folded small-spatial path (cols=20 -> g=4), single row block.
    x3 = jax.random.uniform(k3, (4, 80, 4, 5), jnp.float32, 0.0, 2.0)
    check(x3, p3, 1e-4, 1e-5)

    # 4) typical GeM shape (7x7 spatial): fold g=2 + two parallel row blocks.
    x4 = jax.random.uniform(k4, (2, 256, 7, 7), jnp.float32, -0.5, 4.0)
    check(x4, p3, 1e-4, 1e-5)

    # 5) bf16 input, native bf16 in-kernel compute (v6e/v7x path), loose tol.
    x5 = jax.random.uniform(k5, (2, 64, 8, 8), jnp.float32,
                            0.0, 2.0).astype(jnp.bfloat16)
    check(x5, p3, 3e-2, 3e-2)

    print("KERNEL_OK")
</pallas_src>

<mosaic_0001>
module attributes {stable_mosaic.version = 11 : i64} {
  func.func @_gem_kernel(%arg0: i32, %arg1: i32, %arg2: memref<1xf32, #tpu.memory_space<smem>>, %arg3: memref<8x256xf32, #tpu.memory_space<vmem>>, %arg4: memref<1x8xf32, #tpu.memory_space<vmem>>, %arg5: memref<8x128xf32, #tpu.memory_space<vmem>>) attributes {dimension_semantics = [#tpu.dimension_semantics<parallel>, #tpu.dimension_semantics<arbitrary>], iteration_bounds = array<i64: 1, 1>, scalar_prefetch = 1 : i64, scratch_operands = 1 : i64, tpu.core_type = #tpu.core_type<tc>, window_params = [{transform_indices = @transform_0, window_bounds = array<i64: 8, 256>}, {transform_indices = @transform_1, window_bounds = array<i64: 1, 8>}]} {
    %c0_i32 = arith.constant 0 : i32
    %0 = arith.cmpi eq, %arg1, %c0_i32 : i32
    %1 = arith.extui %0 : i1 to i32
    %c0_i32_0 = arith.constant 0 : i32
    %2 = arith.cmpi ne, %1, %c0_i32_0 : i32
    scf.if %2 {
      %cst_14 = arith.constant 0.000000e+00 : f32
      %22 = vector.broadcast %cst_14 : f32 to vector<8x128xf32>
      %c0_15 = arith.constant 0 : index
      %c0_16 = arith.constant 0 : index
      %23 = vector.load %arg5[%c0_15, %c0_16] : memref<8x128xf32, #tpu.memory_space<vmem>>, vector<8x128xf32>
      tpu.vector_store %arg5[%c0_15, %c0_16], %22 {strides = array<i32>} : memref<8x128xf32, #tpu.memory_space<vmem>>, vector<8x128xf32>,
    } else {
    }
    %c0 = arith.constant 0 : index
    %c0_1 = arith.constant 0 : index
    %3 = vector.load %arg5[%c0, %c0_1] : memref<8x128xf32, #tpu.memory_space<vmem>>, vector<8x128xf32>
    %c0_2 = arith.constant 0 : index
    %c0_3 = arith.constant 0 : index
    %4 = vector.load %arg3[%c0_2, %c0_3] : memref<8x256xf32, #tpu.memory_space<vmem>>, vector<8x128xf32>
    %cst = arith.constant 9.99999997E-7 : f32
    %5 = vector.broadcast %cst : f32 to vector<8x128xf32>
    %6 = arith.maximumf %4, %5 : vector<8x128xf32>
    %7 = arith.mulf %6, %6 : vector<8x128xf32>
    %8 = arith.mulf %7, %6 : vector<8x128xf32>
    %9 = arith.addf %3, %8 : vector<8x128xf32>
    %c0_4 = arith.constant 0 : index
    %c0_5 = arith.constant 0 : index
    %10 = vector.load %arg5[%c0_4, %c0_5] : memref<8x128xf32, #tpu.memory_space<vmem>>, vector<8x128xf32>
    tpu.vector_store %arg5[%c0_4, %c0_5], %9 {strides = array<i32>} : memref<8x128xf32, #tpu.memory_space<vmem>>, vector<8x128xf32>,
    %c0_6 = arith.constant 0 : index
    %c0_7 = arith.constant 0 : index
    %11 = vector.load %arg5[%c0_6, %c0_7] : memref<8x128xf32, #tpu.memory_space<vmem>>, vector<8x128xf32>
    %c0_8 = arith.constant 0 : index
    %c128 = arith.constant 128 : index
    %12 = vector.load %arg3[%c0_8, %c128] : memref<8x256xf32, #tpu.memory_space<vmem>>, vector<8x128xf32>
    %cst_9 = arith.constant 9.99999997E-7 : f32
    %13 = vector.broadcast %cst_9 : f32 to vector<8x128xf32>
    %14 = arith.maximumf %12, %13 : vector<8x128xf32>
    %15 = arith.mulf %14, %14 : vector<8x128xf32>
    %16 = arith.mulf %15, %14 : vector<8x128xf32>
    %17 = arith.addf %11, %16 : vector<8x128xf32>
    %c0_10 = arith.constant 0 : index
    %c0_11 = arith.constant 0 : index
    %18 = vector.load %arg5[%c0_10, %c0_11] : memref<8x128xf32, #tpu.memory_space<vmem>>, vector<8x128xf32>
    tpu.vector_store %arg5[%c0_10, %c0_11], %17 {strides = array<i32>} : memref<8x128xf32, #tpu.memory_space<vmem>>, vector<8x128xf32>,
    %c0_i32_12 = arith.constant 0 : i32
    %19 = arith.cmpi eq, %arg1, %c0_i32_12 : i32
    %20 = arith.extui %19 : i1 to i32
    %c0_i32_13 = arith.constant 0 : i32
    %21 = arith.cmpi ne, %20, %c0_i32_13 : i32
    scf.if %21 {
      %cst_14 = arith.constant 1.000000e+00 : f32
      %22 = vector.broadcast %cst_14 : f32 to vector<1x128xf32>
      %c0_15 = arith.constant 0 : index
      %c0_16 = arith.constant 0 : index
      %23 = vector.load %arg5[%c0_15, %c0_16] : memref<8x128xf32, #tpu.memory_space<vmem>>, vector<8x128xf32>
      %cst_17 = arith.constant dense<0.000000e+00> : vector<1x8xf32>
      %24 = tpu.matmul %22, %23, %cst_17 {dimension_numbers = #tpu.dot_dimension_numbers<[1], [1], [0], [0], [0, 0, 1, 0], [], []>, precision = #tpu.contract_precision<fp32>} : vector<1x128xf32>, vector<8x128xf32>, vector<1x8xf32> -> vector<1x8xf32>
      %cst_18 = arith.constant 3.906250e-03 : f32
      %25 = vector.broadcast %cst_18 : f32 to vector<1x8xf32>
      %26 = arith.mulf %24, %25 : vector<1x8xf32>
      %c0_19 = arith.constant 0 : index
      %27 = memref.load %arg2[%c0_19] : memref<1xf32, #tpu.memory_space<smem>>
      %cst_20 = arith.constant 1.000000e+00 : f32
      %28 = arith.divf %cst_20, %27 : f32
      %29 = math.log %26 : vector<1x8xf32>
      %30 = vector.broadcast %28 : f32 to vector<1x8xf32>
      %31 = arith.mulf %29, %30 : vector<1x8xf32>
      %32 = math.exp %31 : vector<1x8xf32>
      %c0_21 = arith.constant 0 : index
      %c0_22 = arith.constant 0 : index
      %33 = vector.load %arg4[%c0_21, %c0_22] : memref<1x8xf32, #tpu.memory_space<vmem>>, vector<1x8xf32>
      tpu.vector_store %arg4[%c0_21, %c0_22], %32 {strides = array<i32>} : memref<1x8xf32, #tpu.memory_space<vmem>>, vector<1x8xf32>,
    } else {
    }
    return
  }
  func.func @transform_0(%arg0: i32, %arg1: i32, %arg2: memref<1xf32, #tpu.memory_space<smem>>) -> (i32, i32) {
    %c0_i32 = arith.constant 0 : i32
    return %arg0, %arg1 : i32, i32
  }
  func.func @transform_1(%arg0: i32, %arg1: i32, %arg2: memref<1xf32, #tpu.memory_space<smem>>) -> (i32, i32) {
    %c0_i32 = arith.constant 0 : i32
    %c0_i32_0 = arith.constant 0 : i32
    return %c0_i32, %arg0 : i32, i32
  }
}

</mosaic_0001>

<bundles_post_ra>
// kernel: tpu_custom_call.1
= control target key start
LH: loop header
LB: loop body
LE: loop exit
PB: predicated region body
PF: predicated region fallthrough
CT: control target
= control target key end

     0   :  { %8 = vsyncpa [#allocation6], 0  ;;  %s672_s0 = inlined_call_operand.<no memory space> [shape: f32[1], index: 0, kind: input, shape index: {}]   ;;  %s673_s1 = inlined_call_operand.hbm [shape: f32[8,256], index: 1, kind: input, shape index: {}]   ;;  %s674_s2 = inlined_call_operand.hbm [shape: f32[1,8], index: 2, kind: output, shape index: {}]  }
   0x1   :  { %9 = vsyncpa [#allocation7], 0  ;;  %s619_s9 = smov [#allocation5]   ;;  %s571_s13 = scalar_lea.hbm %s673_s1, 256 }
   0x2   :  { %s16_s10 = sshll.u32 %s619_s9, 4  ;;  %p572_p0 = scmp.ne.s32.totalorder %s673_s1, %s571_s13  ;;  %s17_s10 = int_to_ptr.vmem [resolvable:$true] %s16_s10 }
   0x3   :  { %p575_p1 = scmp.lt.u32.totalorder %s571_s13, %s673_s1 }
   0x5   :  { %p577_p2 = pnand %p575_p1, %p572_p0 }
   0x7   :  { %580 = shalt.err (!%p577_p2)
}
   0x8   :  { %s581_s18 = scalar_lea.vmem %s17_s10, 256  ;;  %p586_p4 = scmp.lt.s32.totalorder %s17_s10, %s17_s10 }
   0x9   :  { %p582_p3 = scmp.ne.s32.totalorder %s17_s10, %s581_s18  ;;  %p587_p5 = scmp.lt.s32.totalorder %s581_s18, %s581_s18 }
   0xb   :  { %p588_p6 = por %p587_p5, %p586_p4 }
   0xd   :  { %p589_p7 = pnand %p588_p6, %p582_p3 }
   0xf   :  { %592 = shalt.err (!%p589_p7)
}
  0x10   :  { %19 = dma.hbm_to_vmem [thread:$0]  %s673_s1, 256, %s17_s10, [#allocation6]  }
  0x11   :  { %615 = dma.done.wait [#allocation6], 256  }
  0x12   :  { %616 = vsyncadd [#allocation6], 4294967040  ;;  %v481_v0 = vstv %s672_s0  ;;  %v620_v1 = vmov 0.0   ;;  %vm621_vm0 = vmmov 0   ;;  %v29_v2 = vld [vmem:[#allocation5] sm:$0xff]  ;;  %v36_v3 = vld [vmem:[#allocation5 + $0x8] sm:$0xff] }
  0x13   :  { %519 = vmatprep.subr.mxu1 %v620_v1  ;;  %534 = vmatprep.subr.mxu0 %v620_v1  ;;  %565 = vrcp.f32 %v481_v0  ;;  %v30_v4 = vmax.f32 %v29_v2, 1e-06  ;;  %v37_v5 = vmax.f32 %v36_v3, 1e-06  ;;  %v622_v17 = vmov 1.0   ;;  %s623_s1 = smov [#allocation8]  }
  0x14   :  { %521 = vmatprep.mubr.msk.f32.mxu1 %vm621_vm0, %v620_v1  ;;  %536 = vmatprep.mubr.msk.f32.mxu0 %vm621_vm0, %v620_v1  ;;  %s498_s23 = sshll.u32 %s623_s1, 4  ;;  %vm490_vm1 = vcmask 57344   ;;  %s499_s23 = int_to_ptr.vmem [resolvable:$true] %s498_s23 }
  0x15   :  { %v31_v6 = vmul.f32 %v30_v4, %v30_v4  ;;  %v38_v7 = vmul.f32 %v37_v5, %v37_v5  ;;  %s593_s24 = scalar_lea.vmem %s499_s23, 16  ;;  %s597_s25 = scalar_lea.vmem %s499_s23, 32 }
  0x16   :  { %p594_p8 = scmp.ne.s32.totalorder %s499_s23, %s593_s24  ;;  %p598_p9 = scmp.lt.s32.totalorder %s499_s23, %s499_s23 }
  0x17   :  { %v32_v9 = vmul.f32 %v31_v6, %v30_v4  ;;  %v39_v10 = vmul.f32 %v38_v7, %v37_v5  ;;  %p599_p10 = scmp.lt.s32.totalorder %s597_s25, %s593_s24 }
  0x19   :  { %v40_v11 = vadd.f32 %v39_v10, %v32_v9  ;;  %p600_p11 = por %p599_p10, %p598_p9 }
  0x1b   :  { %v47_v12 = vand.u32 4294901760, %v40_v11  ;;  %p601_p12 = pnand %p600_p11, %p594_p8 }
  0x1d   :  { %v566_v8 = vpop.eup %565  ;;  %520 = vmatpush3.xpose.msra.mxu1 %v47_v12  ;;  %v119_v13 = vsub.f32 %v40_v11, %v47_v12  ;;  %535 = vmatpush3.xpose.msra.mxu0 %v47_v12 }
  0x1e   :  { %558 = vpush %v566_v8  ;;  %524 = vmatprep.subr.mxu1 %v620_v1  ;;  %539 = vmatprep.subr.mxu0 %v620_v1 }
  0x1f   :  { %v120_v14 = vand.u32 4294901760, %v119_v13 }
  0x20   :  { %522 = vmatmul.mubr.f32.vlgmr.msra.gmra.mrb[0].mxu1 %v620_v1  ;;  %537 = vmatmul.mubr.f32.vlgmr.msra.gmra.mrb[0].mxu0 %v620_v1 }
  0x21   :  { %v121_v15 = vsub.f32 %v119_v13, %v120_v14  ;;  %540 = vmatpush3.xpose.msra.mxu0 %v120_v14  ;;  %526 = vmatprep.mubr.msk.f32.mxu1 %vm621_vm0, %v620_v1 }
  0x22   :  { %541 = vmatprep.mubr.msk.f32.mxu0 %vm621_vm0, %v620_v1  ;;  %544 = vmatprep.subr.mxu0 %v620_v1 }
  0x23   :  { %v122_v16 = vand.u32 4294901760, %v121_v15 }
  0x25   :  { %525 = vmatpush3.xpose.msra.mxu1 %v122_v16 }
  0x26   :  { %529 = vmatprep.subr.mxu1 %v620_v1 }
  0x28   :  { %527 = vmatmul.mubr.f32.vlgmr.msra.gmra.mrb[0].mxu1 %v622_v17  ;;  %542 = vmatmul.mubr.f32.vlgmr.msra.gmra.mrb[0].mxu0 %v622_v17 }
  0x29   :  { %530 = vmatpush3.xpose.msra.mxu1 %v119_v13  ;;  %545 = vmatpush3.xpose.msra.mxu0 %v47_v12 }
  0x2a   :  { %531 = vmatprep.mubr.msk.f32.mxu1 %vm621_vm0, %v620_v1  ;;  %546 = vmatprep.mubr.msk.f32.mxu0 %vm621_vm0, %v620_v1 }
  0x30   :  { %532 = vmatmul.mubr.f32.vlgmr.msra.gmra.mrb[0].mxu1 %v620_v1  ;;  %547 = vmatmul.mubr.f32.vlgmr.msra.gmra.mrb[0].mxu0 %v622_v17 }
  0x4f   :  { %s559_s0 = spop %558 }
  0x50   :  { %v486_v25 = vstv %s559_s0 }
 0x103   :  { %v260_v18 = vpop.f32.mrb[0].mxu1  ;;  %v475_v19 = vpop.f32.mrb[0].mxu0 }
 0x104   :  { %v549_v20 = vadd.f32 %v475_v19, %v260_v18  ;;  %v533_v21 = vpop.f32.mrb[1].mxu1  ;;  %v548_v22 = vpop.f32.mrb[1].mxu0 }
 0x106   :  { %v479_v23 = vmul.f32 0.00390625, %v549_v20 }
 0x108   :  { %567 = vlog2.f32 %v479_v23 }
 0x112   :  { %v568_v24 = vpop.eup %567 }
 0x113   :  { %v485_v26 = vmul.f32 0.6931472, %v568_v24 }
 0x115   :  { %v487_v27 = vmul.f32 %v486_v25, %v485_v26 }
 0x117   :  { %v488_v28 = vmul.f32 1.442695, %v487_v27 }
 0x119   :  { %569 = vpow2.f32 %v488_v28 }
 0x123   :  { %v570_v29 = vpop.eup %569 }
 0x124   :  { %491 = vst.msk [vmem:[#allocation8] sm:$0x1] %vm490_vm1, %v570_v29 }
 0x125   :  { %604 = shalt.err (!%p601_p12)
}
 0x126   :  { %s605_s28 = scalar_lea.hbm %s674_s2, 16 }
 0x127   :  { %p606_p13 = scmp.ne.s32.totalorder %s674_s2, %s605_s28  ;;  %p609_p0 = scmp.lt.u32.totalorder %s605_s28, %s674_s2 }
 0x129   :  { %p611_p1 = pnand %p609_p0, %p606_p13 }
 0x12b   :  { %614 = shalt.err (!%p611_p1)
}
 0x12c   :  { %501 = dma.vmem_to_hbm [thread:$0]  %s499_s23, 16, %s674_s2, [#allocation7]  }
 0x12d   :  { %617 = dma.done.wait [#allocation7], 16  }
 0x12e   :  { %618 = vsyncadd [#allocation7], 4294967280 }
 0x12f   :  { %505 = vsyncpa [#allocation6], 1 }
 0x130   :  { %506 = vsyncpa [#allocation7], 1 }

</bundles_post_ra>
